<compile_context>
chip_gen: v7x
topology: tpu7x:2x2x1
jax: 0.10.0
libtpu: 0.0.40
codegen_flags: <defaults>
</compile_context>

<pallas_src>
import functools

import jax
import jax.numpy as jnp
import numpy as np
from jax.experimental import pallas as pl
from jax.experimental.pallas import tpu as pltpu

NEG_SLOPE = 0.01   # nn.LeakyReLU default
BN_EPS = 1e-5      # nn.BatchNorm2d default
KW = 4             # kernel width is 4 in both module configurations


def _convT_stats_kernel(xp_ref, w_ref, y_ref, stats_ref, *, kh_size, out_h, out_w):
    """Fused ConvTranspose2d (one MXU matmul per image) + BN partial statistics.

    xp_ref   : (b_tile, Hp, Wp, Cin)   pre-padded NHWC input block
    w_ref    : (3*KH*Cin, 2*Cout)      packed weight (even | odd column halves)
    y_ref    : (b_tile, 2*Cout, H*W)   conv output, channel-major (lane = H*W)
    stats_ref: (1, 2, 2*Cout)          [sum; sum of squares] for this grid step
    """
    b_tile = xp_ref.shape[0]
    cin = xp_ref.shape[-1]
    c2 = y_ref.shape[1]
    H, W = out_h, out_w

    s_acc = jnp.zeros((1, c2), jnp.float32)
    q_acc = jnp.zeros((1, c2), jnp.float32)

    for b in range(b_tile):
        xp = xp_ref[b]                                   # (Hp, Wp, Cin)

        # Register-level im2col: one (H, W, Cin) window per (dh, dc) tap,
        # lane-concatenated; a single leading-dim merge right before the dot
        # (no VMEM scratch, no masked partial stores, no per-tap reshapes).
        wins = []
        for dh in range(kh_size):
            for dc in range(3):
                wins.append(xp[dh:dh + H, dc:dc + W, :])
        lhs = jnp.concatenate(wins, axis=-1)             # (H, W, 3*KH*Cin)
        lhs = lhs.reshape(H * W, 3 * kh_size * cin)      # leading-dim merge only

        # One MXU matmul for the whole transposed conv of this image.
        # Columns [:Cout] are the even output columns, [Cout:] the odd ones.
        y = jnp.dot(lhs, w_ref[...], preferred_element_type=jnp.float32)  # (M, C2)

        # BN partial statistics in f32 (reduced across grid steps in the wrapper).
        s_acc = s_acc + jnp.sum(y, axis=0, keepdims=True)
        q_acc = q_acc + jnp.sum(y * y, axis=0, keepdims=True)

        # Channel-major store: lane dim = H*W >= 128 -> full-lane-width stores.
        y_ref[b] = y.T.astype(y_ref.dtype)               # (C2, M)

    # Single fused stats write per grid step (no read-modify-write).
    stats_ref[0] = jnp.concatenate([s_acc, q_acc], axis=0)


def _pack_weight(weight, kh_size, dtype):
    """Pack (Cin, Cout, KH, KW) ConvTranspose2d weight into (3*KH*Cin, 2*Cout).

    Tap order matches the kernel's window order (dh major, dc in 0..2):
      window (dh, dc) reads padded x at (oh + dh, m + dc) which corresponds to
      conv kernel row kh = KH-1-dh and, per output parity,
        even (ow=2m): dc=0 -> kw=3, dc=1 -> kw=1, dc=2 -> (none)
        odd  (ow=2m+1): dc=0 -> (none), dc=1 -> kw=2, dc=2 -> kw=0
    """
    cin, cout = weight.shape[0], weight.shape[1]
    w_t = jnp.transpose(weight, (2, 3, 0, 1))            # (KH, KW, Cin, Cout)
    zblk = jnp.zeros((cin, cout), weight.dtype)
    blocks = []
    for dh in range(kh_size):
        kh = kh_size - 1 - dh
        for dc in range(3):
            w_even = w_t[kh, 3] if dc == 0 else (w_t[kh, 1] if dc == 1 else zblk)
            w_odd = zblk if dc == 0 else (w_t[kh, 2] if dc == 1 else w_t[kh, 0])
            blocks.append(jnp.concatenate([w_even, w_odd], axis=1))
    return jnp.concatenate(blocks, axis=0).astype(dtype)  # (3*KH*Cin, 2*Cout)


def vqvae_dec_block(x_nchw, weight, bias, gamma, beta, *, frequency_indepence):
    """Forward pass of VQVAEDecBlock. weight layout is PyTorch's (Cin,Cout,KH,KW).

    `bias` is accepted for API parity but is mathematically redundant: a
    per-channel constant before training-mode BatchNorm is exactly absorbed by
    the batch-mean subtraction (variance is unaffected).
    """
    del bias
    kh_size, pad_h = (1, 0) if frequency_indepence else (3, 1)
    N, Cin, H, W = x_nchw.shape
    Cout = weight.shape[1]
    assert weight.shape == (Cin, Cout, kh_size, KW)

    C2 = 2 * Cout
    KT = 3 * kh_size
    M = H * W
    Hp = H + kh_size - 1
    Wp = W + 2
    top = kh_size - 1 - pad_h            # general transposed-conv padding split
    bot = pad_h
    dtype = x_nchw.dtype
    itemsize = jnp.dtype(dtype).itemsize

    # ---- batch tiling (amortize per-step overhead, keep VMEM bounded) --------
    per_img_blocks = (Hp * Wp * Cin + C2 * M) * itemsize        # in + out blocks
    per_img_work = M * (KT * Cin + 2 * C2) * 4                  # in-kernel values
    fit = max(1, (8 << 20) // max(1, 2 * per_img_blocks + per_img_work))
    b_tile = int(max(1, min(8, fit, -(-N // 4))))               # keep >=~4 steps
    G = -(-N // b_tile)
    N_pad = G * b_tile                                          # zero-pad batch

    # ---- pre-pad + relayout the (small) input once: fused XLA transpose+pad --
    # Padded batch images are all-zero; with no bias they contribute exactly 0
    # to the BN partial sums, so they are harmless.
    x = jnp.transpose(x_nchw, (0, 2, 3, 1))                     # (N, H, W, Cin)
    x = jnp.pad(x, ((0, N_pad - N), (top, bot), (1, 1), (0, 0)))

    w_packed = _pack_weight(weight, kh_size, dtype)             # (KT*Cin, C2)

    kern = functools.partial(_convT_stats_kernel,
                             kh_size=kh_size, out_h=H, out_w=W)
    cost = pl.CostEstimate(
        flops=2 * N_pad * M * KT * Cin * C2,
        transcendentals=0,
        bytes_accessed=(N_pad * Hp * Wp * Cin * itemsize
                        + KT * Cin * C2 * itemsize
                        + N_pad * C2 * M * itemsize
                        + G * 2 * C2 * 4))
    vmem_limit = int(min(32 << 20,
                         max(8 << 20,
                             2 * b_tile * per_img_blocks
                             + b_tile * per_img_work + (2 << 20))))

    conv_cm, stats = pl.pallas_call(
        kern,
        grid=(G,),
        in_specs=[
            pl.BlockSpec((b_tile, Hp, Wp, Cin), lambda g: (g, 0, 0, 0)),
            pl.BlockSpec((KT * Cin, C2), lambda g: (0, 0)),     # resident weight
        ],
        out_specs=(
            pl.BlockSpec((b_tile, C2, M), lambda g: (g, 0, 0)),  # lane-dense
            pl.BlockSpec((1, 2, C2), lambda g: (g, 0, 0)),       # partial stats
        ),
        out_shape=(
            jax.ShapeDtypeStruct((N_pad, C2, M), dtype),
            jax.ShapeDtypeStruct((G, 2, C2), jnp.float32),
        ),
        compiler_params=pltpu.CompilerParams(
            dimension_semantics=("parallel",),                   # 2 TCs on v7x
            vmem_limit_bytes=vmem_limit),
        cost_estimate=cost,
    )(x, w_packed)

    # ---- fold batch statistics (training-mode BN, biased variance) ----------
    cnt = jnp.float32(N * H * 2 * W)
    s = jnp.sum(stats, axis=0)                                   # (2, C2)
    sum_c = s[0, :Cout] + s[0, Cout:]                            # even + odd cols
    sq_c = s[1, :Cout] + s[1, Cout:]
    mean = sum_c / cnt
    var = jnp.maximum(sq_c / cnt - mean * mean, 0.0)
    inv = jax.lax.rsqrt(var + BN_EPS)
    scale = gamma.astype(jnp.float32) * inv
    shift = beta.astype(jnp.float32) - mean * scale

    # ---- BN apply + LeakyReLU + NCHW relayout: ONE fused XLA pass ------------
    # conv_cm rows are [parity (even|odd), Cout]; spatial is row-major (H, W).
    y = conv_cm[:N].astype(jnp.float32).reshape(N, 2, Cout, H, W)
    y = y * scale.reshape(1, 1, Cout, 1, 1) + shift.reshape(1, 1, Cout, 1, 1)
    y = jnp.where(y > 0, y, NEG_SLOPE * y)
    # (N,2,Cout,H,W) -> (N,Cout,H,W,2) -> (N,Cout,H,2W): parity is the fastest
    # width bit, i.e. ow = 2*iw + parity (the stride-2 column interleave).
    out = jnp.transpose(y, (0, 2, 3, 4, 1)).reshape(N, Cout, H, 2 * W)
    return out.astype(dtype)                                     # Dropout(0.0) = id


vqvae_dec_block_jit = jax.jit(vqvae_dec_block,
                              static_argnames=("frequency_indepence",))


def _reference(x, w, b, gamma, beta, kh_size, pad_h):
    """Pure numpy (float64) reference of the PyTorch module forward."""
    xn = np.asarray(x, np.float64)
    wn = np.asarray(w, np.float64)
    bn = np.asarray(b, np.float64)
    gn = np.asarray(gamma, np.float64)
    btn = np.asarray(beta, np.float64)
    N, Cin, H, W = xn.shape
    Cout = wn.shape[1]
    Ho, Wo = H - 2 * pad_h + kh_size - 1, 2 * W
    y = np.zeros((N, Cout, Ho, Wo))
    for kh in range(kh_size):
        for kw in range(KW):
            for ih in range(H):
                oh = ih - pad_h + kh
                if oh < 0 or oh >= Ho:
                    continue
                for iw in range(W):
                    ow = 2 * iw - 1 + kw
                    if ow < 0 or ow >= Wo:
                        continue
                    y[:, :, oh, ow] += np.einsum('nc,cd->nd',
                                                 xn[:, :, ih, iw],
                                                 wn[:, :, kh, kw])
    y += bn.reshape(1, Cout, 1, 1)
    mean = y.mean(axis=(0, 2, 3), keepdims=True)
    var = y.var(axis=(0, 2, 3), keepdims=True)            # biased, training mode
    z = (y - mean) / np.sqrt(var + BN_EPS)
    z = gn.reshape(1, Cout, 1, 1) * z + btn.reshape(1, Cout, 1, 1)
    return np.where(z > 0, z, NEG_SLOPE * z)


if __name__ == "__main__":
    N, Cin, Cout, H, W = 2, 4, 8, 16, 8
    key = jax.random.PRNGKey(0)

    for frequency_indepence in (False, True):
        kh = 1 if frequency_indepence else 3
        ph = 0 if frequency_indepence else 1
        key, k1, k2, k3, k4, k5 = jax.random.split(key, 6)
        x = jax.random.normal(k1, (N, Cin, H, W), jnp.float32)
        weight = 0.1 * jax.random.normal(k2, (Cin, Cout, kh, KW), jnp.float32)
        bias = 0.1 * jax.random.normal(k3, (Cout,), jnp.float32)
        gamma = 1.0 + 0.1 * jax.random.normal(k4, (Cout,), jnp.float32)
        beta = 0.1 * jax.random.normal(k5, (Cout,), jnp.float32)

        out = vqvae_dec_block_jit(x, weight, bias, gamma, beta,
                                  frequency_indepence=frequency_indepence)
        out = jax.block_until_ready(out)

        assert out.shape == (N, Cout, H, 2 * W), out.shape
        assert out.dtype == jnp.float32
        assert bool(jnp.all(jnp.isfinite(out)))

        ref = _reference(x, weight, bias, gamma, beta, kh, ph)
        np.testing.assert_allclose(np.asarray(out), ref, rtol=3e-2, atol=3e-2)

    print("KERNEL_OK")
</pallas_src>

<mosaic_0001>
module attributes {stable_mosaic.version = 11 : i64} {
  func.func @_convT_stats_kernel(%arg0: i32, %arg1: memref<1x18x10x4xf32, #tpu.memory_space<vmem>>, %arg2: memref<36x16xf32, #tpu.memory_space<vmem>>, %arg3: memref<1x16x128xf32, #tpu.memory_space<vmem>>, %arg4: memref<1x2x16xf32, #tpu.memory_space<vmem>>) attributes {dimension_semantics = [#tpu.dimension_semantics<parallel>], iteration_bounds = array<i64: 2>, scalar_prefetch = 0 : i64, scratch_operands = 0 : i64, tpu.core_type = #tpu.core_type<tc>, window_params = [{transform_indices = @transform_0, window_bounds = array<i64: 1, 18, 10, 4>}, {pipeline_mode = #tpu.pipeline_mode<synchronous>, transform_indices = @transform_1, window_bounds = array<i64: 36, 16>}, {transform_indices = @transform_2, window_bounds = array<i64: 1, 16, 128>}, {transform_indices = @transform_3, window_bounds = array<i64: 1, 2, 16>}]} {
    %cst = arith.constant 0.000000e+00 : f32
    %0 = vector.broadcast %cst : f32 to vector<1x16xf32>
    %cst_0 = arith.constant 0.000000e+00 : f32
    %1 = vector.broadcast %cst_0 : f32 to vector<1x16xf32>
    %c0 = arith.constant 0 : index
    %c0_1 = arith.constant 0 : index
    %c0_2 = arith.constant 0 : index
    %c0_3 = arith.constant 0 : index
    %2 = vector.load %arg1[%c0, %c0_1, %c0_2, %c0_3] : memref<1x18x10x4xf32, #tpu.memory_space<vmem>>, vector<1x18x10x4xf32>
    %3 = vector.shape_cast %2 : vector<1x18x10x4xf32> to vector<18x10x4xf32>
    %4 = vector.extract_strided_slice %3 {offsets = [0, 0, 0], sizes = [16, 8, 4], strides = [1, 1, 1]} : vector<18x10x4xf32> to vector<16x8x4xf32>
    %5 = vector.extract_strided_slice %3 {offsets = [0, 1, 0], sizes = [16, 8, 4], strides = [1, 1, 1]} : vector<18x10x4xf32> to vector<16x8x4xf32>
    %6 = vector.extract_strided_slice %3 {offsets = [0, 2, 0], sizes = [16, 8, 4], strides = [1, 1, 1]} : vector<18x10x4xf32> to vector<16x8x4xf32>
    %7 = vector.extract_strided_slice %3 {offsets = [1, 0, 0], sizes = [16, 8, 4], strides = [1, 1, 1]} : vector<18x10x4xf32> to vector<16x8x4xf32>
    %8 = vector.extract_strided_slice %3 {offsets = [1, 1, 0], sizes = [16, 8, 4], strides = [1, 1, 1]} : vector<18x10x4xf32> to vector<16x8x4xf32>
    %9 = vector.extract_strided_slice %3 {offsets = [1, 2, 0], sizes = [16, 8, 4], strides = [1, 1, 1]} : vector<18x10x4xf32> to vector<16x8x4xf32>
    %10 = vector.extract_strided_slice %3 {offsets = [2, 0, 0], sizes = [16, 8, 4], strides = [1, 1, 1]} : vector<18x10x4xf32> to vector<16x8x4xf32>
    %11 = vector.extract_strided_slice %3 {offsets = [2, 1, 0], sizes = [16, 8, 4], strides = [1, 1, 1]} : vector<18x10x4xf32> to vector<16x8x4xf32>
    %12 = vector.extract_strided_slice %3 {offsets = [2, 2, 0], sizes = [16, 8, 4], strides = [1, 1, 1]} : vector<18x10x4xf32> to vector<16x8x4xf32>
    %13 = tpu.concatenate %4, %5, %6, %7, %8, %9, %10, %11, %12 in 2 : vector<16x8x4xf32>, vector<16x8x4xf32>, vector<16x8x4xf32>, vector<16x8x4xf32>, vector<16x8x4xf32>, vector<16x8x4xf32>, vector<16x8x4xf32>, vector<16x8x4xf32>, vector<16x8x4xf32> -> vector<16x8x36xf32>
    %14 = vector.shape_cast %13 : vector<16x8x36xf32> to vector<128x36xf32>
    %c0_4 = arith.constant 0 : index
    %c0_5 = arith.constant 0 : index
    %15 = vector.load %arg2[%c0_4, %c0_5] : memref<36x16xf32, #tpu.memory_space<vmem>>, vector<36x16xf32>
    %cst_6 = arith.constant dense<0.000000e+00> : vector<128x16xf32>
    %16 = tpu.matmul %14, %15, %cst_6 {dimension_numbers = #tpu.dot_dimension_numbers<[1], [0], [0], [1], [0, 0, 1, 1], [], []>} : vector<128x36xf32>, vector<36x16xf32>, vector<128x16xf32> -> vector<128x16xf32>
    %cst_7 = arith.constant dense<0.000000e+00> : vector<16xf32>
    %17 = vector.multi_reduction <add>, %16, %cst_7 [0] : vector<128x16xf32> to vector<16xf32>
    %18 = vector.shape_cast %17 : vector<16xf32> to vector<1x16xf32>
    %19 = arith.addf %0, %18 : vector<1x16xf32>
    %20 = arith.mulf %16, %16 : vector<128x16xf32>
    %cst_8 = arith.constant dense<0.000000e+00> : vector<16xf32>
    %21 = vector.multi_reduction <add>, %20, %cst_8 [0] : vector<128x16xf32> to vector<16xf32>
    %22 = vector.shape_cast %21 : vector<16xf32> to vector<1x16xf32>
    %23 = arith.addf %1, %22 : vector<1x16xf32>
    %24 = tpu.transpose %16, [1, 0] : vector<128x16xf32> -> vector<16x128xf32>
    %c0_9 = arith.constant 0 : index
    %c0_10 = arith.constant 0 : index
    %c0_11 = arith.constant 0 : index
    %25 = vector.load %arg3[%c0_9, %c0_10, %c0_11] : memref<1x16x128xf32, #tpu.memory_space<vmem>>, vector<1x16x128xf32>
    %26 = vector.shape_cast %25 : vector<1x16x128xf32> to vector<16x128xf32>
    %27 = vector.shape_cast %24 : vector<16x128xf32> to vector<1x16x128xf32>
    tpu.vector_store %arg3[%c0_9, %c0_10, %c0_11], %27 {strides = array<i32>} : memref<1x16x128xf32, #tpu.memory_space<vmem>>, vector<1x16x128xf32>,
    %28 = tpu.concatenate %19, %23 in 0 : vector<1x16xf32>, vector<1x16xf32> -> vector<2x16xf32>
    %c0_12 = arith.constant 0 : index
    %c0_13 = arith.constant 0 : index
    %c0_14 = arith.constant 0 : index
    %29 = vector.load %arg4[%c0_12, %c0_13, %c0_14] : memref<1x2x16xf32, #tpu.memory_space<vmem>>, vector<1x2x16xf32>
    %30 = vector.shape_cast %29 : vector<1x2x16xf32> to vector<2x16xf32>
    %31 = vector.shape_cast %28 : vector<2x16xf32> to vector<1x2x16xf32>
    tpu.vector_store %arg4[%c0_12, %c0_13, %c0_14], %31 {strides = array<i32>} : memref<1x2x16xf32, #tpu.memory_space<vmem>>, vector<1x2x16xf32>,
    return
  }
  func.func @transform_0(%arg0: i32) -> (i32, i32, i32, i32) {
    %c0_i32 = arith.constant 0 : i32
    %c0_i32_0 = arith.constant 0 : i32
    %c0_i32_1 = arith.constant 0 : i32
    %c0_i32_2 = arith.constant 0 : i32
    return %arg0, %c0_i32, %c0_i32_0, %c0_i32_1 : i32, i32, i32, i32
  }
  func.func @transform_1(%arg0: i32) -> (i32, i32) {
    %c0_i32 = arith.constant 0 : i32
    %c0_i32_0 = arith.constant 0 : i32
    %c0_i32_1 = arith.constant 0 : i32
    return %c0_i32, %c0_i32_0 : i32, i32
  }
  func.func @transform_2(%arg0: i32) -> (i32, i32, i32) {
    %c0_i32 = arith.constant 0 : i32
    %c0_i32_0 = arith.constant 0 : i32
    %c0_i32_1 = arith.constant 0 : i32
    return %arg0, %c0_i32, %c0_i32_0 : i32, i32, i32
  }
  func.func @transform_3(%arg0: i32) -> (i32, i32, i32) {
    %c0_i32 = arith.constant 0 : i32
    %c0_i32_0 = arith.constant 0 : i32
    %c0_i32_1 = arith.constant 0 : i32
    return %arg0, %c0_i32, %c0_i32_0 : i32, i32, i32
  }
}

</mosaic_0001>

<bundles_post_ra>
// kernel: vqvae_dec_block.1
= control target key start
LH: loop header
LB: loop body
LE: loop exit
PB: predicated region body
PF: predicated region fallthrough
CT: control target
= control target key end

     0   :  { %s1454_s12 = smov 0   ;;  %s2074_s0 = inlined_call_operand.vmem [shape: f32[2,18,10,4], index: 0, kind: input, shape index: {}]   ;;  %s2075_s1 = inlined_call_operand.vmem [shape: f32[36,16], index: 1, kind: input, shape index: {}]   ;;  %s2076_s2 = inlined_call_operand.vmem [shape: f32[2,16,128], index: 2, kind: output, shape index: {0}]   ;;  %s2077_s3 = inlined_call_operand.vmem [shape: f32[2,2,16], index: 3, kind: output, shape index: {1}]  }
   0x1 LB: > { %s1303_s13 = sadd.s32 4294967295, %s1424_s12   ;;  %p1307_p0 = scmp.ge.s32.totalorder %s1424_s12, 1  ;;  %s1424_s12 = sphi %s1454_s12, %s14_s12  }
   0x2   : > { %p140_p1 = scmp.lt.s32.totalorder %s1424_s12, 3 }
   0x4   : > { %p141_p2 = pnand %p1307_p0, %p140_p1 }
   0x5   : > { %p168_p3 = scmp.lt.s32.totalorder (!%p141_p2), %s1303_s13, 1  ;;  %vm347_vm0 = vcmask (!%p141_p2), 1045504   ;;  %vm250_vm1 = vcmask (!%p141_p2), 1046528   ;;  %s1426_s18 = smov (!%p141_p2), 12   ;;  %v884_v31 = vld [vmem:[%s2075_s1] sm:$0xff] (!%p141_p2)  ;;  %v885_v32 = vld [vmem:[%s2075_s1 + $0x8] sm:$0xff] (!%p141_p2) }
   0x6   : > { %144 = sbr.rel (%p141_p2) target bundleno = 678 (0x2a6), region = 28  ;;  %s1427_s19 = smov (!%p141_p2), 8   ;;  %v1387_v33 = vpack.c.bf16 (!%p141_p2), %v885_v32, %v884_v31  ;;  %v886_v35 = vld [vmem:[%s2075_s1 + $0x10] sm:$0xff] (!%p141_p2)  ;;  %v887_v36 = vld [vmem:[%s2075_s1 + $0x18] sm:$0xff] (!%p141_p2)  ;;  %v888_v38 = vld [vmem:[%s2075_s1 + $0x20] sm:$0xf] (!%p141_p2) }
   0x7   : > { %s1428_s20 = smov (!%p141_p2), 4   ;;  %s1429_s21 = smov (!%p141_p2), 16   ;;  %v1391_v37 = vpack.c.bf16 (!%p141_p2), %v887_v36, %v886_v35  ;;  %vm938_vm2 = vcmask (!%p141_p2), 1043456   ;;  %vm748_vm3 = vcmask (!%p141_p2), 31744   ;;  %vm765_vm4 = vcmask (!%p141_p2), 64512  }
   0x8   : > { %s1430_s22 = smov (!%p141_p2), 20   ;;  %s1431_s27 = smov (!%p141_p2), 24   ;;  %1388 = vmatprep.subr.bf16.mxu0 (!%p141_p2), %v1387_v33  ;;  %1395 = vmatprep.subr.bf16.mxu1 (!%p141_p2), %v1387_v33  ;;  %vm782_vm5 = vcmask (!%p141_p2), 97280   ;;  %vm799_vm6 = vcmask (!%p141_p2), 130048   ;;  %vm816_vm7 = vcmask (!%p141_p2), 162816   ;;  %vm833_vm8 = vcmask (!%p141_p2), 195584  }
   0x9   : > { %1390 = vmatpush3.bf16.msra.mxu0 (!%p141_p2), %v1387_v33  ;;  %1398 = vmatpush3.bf16.msra.mxu1 (!%p141_p2), %v1387_v33  ;;  %s1432_s5 = smov (!%p141_p2), 28   ;;  %s1433_s8 = smov (!%p141_p2), 32   ;;  %vm850_vm9 = vcmask (!%p141_p2), 228352   ;;  %vm867_vm10 = vcmask (!%p141_p2), 261120   ;;  %vm889_vm11 = vcmask (!%p141_p2), 293888   ;;  %vm1213_vm12 = vcmask (!%p141_p2), 1040384  }
   0xa   : > { %1392 = vmatprep.subr.bf16.mxu0 (!%p141_p2), %v1391_v37  ;;  %1396 = vmatprep.subr.bf16.mxu1 (!%p141_p2), %v1391_v37  ;;  %vm1215_vm13 = vcmask (!%p141_p2), 123904  }
   0xd   : > { %s2079_s13 = smov (!%p168_p3, %s1303_s13), 1  ;;  %1394 = vmatpush3.bf16.msra.mxu0 %v1391_v37  ;;  %1399 = vmatpush3.bf16.msra.mxu1 %v1391_v37 }
   0xe   : > { %s1401_s14 = smul.u32 288, %s2079_s13  ;;  %1361 = vmatprep.subr.msk.mxu0 %vm938_vm2, %v888_v38  ;;  %1397 = vmatprep.subr.msk.mxu1 %vm938_vm2, %v888_v38  ;;  %s1311_s9 = sshll.u32 %s2079_s13, 1 }
   0xf   : > { %s1331_s15 = sshll.u32 %s2079_s13, 4 }
  0x10   : > { %s1468_s17 = scalar_lea.vmem %s2074_s0, %s1401_s14  ;;  %s181_s14 = scalar_lea.vmem %s2077_s3, %s1311_s9 }
  0x11   : > { %v1471_v0 = vld [vmem:[%s1468_s17 + $0x20] sm:$0xff]  ;;  %v1474_v1 = vld [vmem:[%s1468_s17 + $0x10] sm:$0xff]  ;;  %v183_v3 = vld [vmem:[%s1468_s17 + $0x8] sm:$0x3]  ;;  %1362 = vmatpush3.msk.msra.mxu0 %vm938_vm2, %v888_v38  ;;  %1400 = vmatpush3.msk.msra.mxu1 %vm938_vm2, %v888_v38 }
  0x12   : > { %v1477_v2 = vld [vmem:[%s1468_s17] sm:$0xff]  ;;  %447 = vrot.lane.b32.xlu1 %v1471_v0, %s1426_s18  ;;  %445 = vrot.lane.b32.xlu0 %v1474_v1, %s1426_s18  ;;  %v185_v6 = vld [vmem:[%s1468_s17 + $0x18] sm:$0x3]  ;;  %v349_v7 = vrot.slane %v183_v3, 2  ;;  %v252_v8 = vrot.slane %v183_v3, 1  ;;  %v351_v9 = vrot.slane %v1474_v1, 2 }
  0x13   : > { %v348_v4 = vrot.slane %v1477_v2, 2  ;;  %v251_v5 = vrot.slane %v1477_v2, 1  ;;  %v352_v10 = vrot.slane %v185_v6, 2  ;;  %v254_v11 = vrot.slane %v1474_v1, 1  ;;  %v187_v13 = vld [vmem:[%s1468_s17 + $0x28] sm:$0x3] }
  0x14   : > { %v255_v12 = vrot.slane %v185_v6, 1  ;;  %v257_v18 = vrot.slane %v1471_v0, 1  ;;  %v258_v19 = vrot.slane %v187_v13, 1  ;;  %v1501_v21 = vld [vmem:[%s1468_s17 + $0x30] sm:$0xff]  ;;  %v189_v22 = vld [vmem:[%s1468_s17 + $0x38] sm:$0x3] }
  0x15   : > { %v350_v14 = vsel %vm347_vm0, %v348_v4, %v349_v7  ;;  %v253_v15 = vsel %vm250_vm1, %v251_v5, %v252_v8  ;;  %v353_v16 = vsel %vm347_vm0, %v351_v9, %v352_v10  ;;  %v354_v23 = vrot.slane %v1471_v0, 2  ;;  %v1541_v39 = vld [vmem:[%s1468_s17 + $0x40] sm:$0xff]  ;;  %v191_v40 = vld [vmem:[%s1468_s17 + $0x48] sm:$0x3]  ;;  %v1552_v44 = vld [vmem:[%s1468_s17 + $0x50] sm:$0xff] }
  0x16   : > { %396 = vrot.lane.b32.xlu1 %v350_v14, %s1427_s19  ;;  %299 = vrot.lane.b32.xlu0 %v253_v15, %s1428_s20  ;;  %v256_v17 = vsel %vm250_vm1, %v254_v11, %v255_v12  ;;  %v259_v20 = vsel %vm250_vm1, %v257_v18, %v258_v19  ;;  %v355_v24 = vrot.slane %v187_v13, 2  ;;  %v260_v25 = vrot.slane %v1501_v21, 1  ;;  %v193_v45 = vld [vmem:[%s1468_s17 + $0x58] sm:$0x3]  ;;  %v1577_v55 = vld [vmem:[%s1468_s17 + $0x60] sm:$0xff] }
  0x17   : > { %v261_v26 = vrot.slane %v189_v22, 1  ;;  %v357_v29 = vrot.slane %v1501_v21, 2  ;;  %v358_v30 = vrot.slane %v189_v22, 2  ;;  %v263_v41 = vrot.slane %v1541_v39, 1  ;;  %v195_v56 = vld [vmem:[%s1468_s17 + $0x68] sm:$0x3] }
  0x18   : > { %v356_v27 = vsel %vm347_vm0, %v354_v23, %v355_v24  ;;  %v264_v42 = vrot.slane %v191_v40, 1  ;;  %v360_v46 = vrot.slane %v1541_v39, 2  ;;  %v361_v47 = vrot.slane %v191_v40, 2  ;;  %v1588_v60 = vld [vmem:[%s1468_s17 + $0x70] sm:$0xff]  ;;  %v197_v61 = vld [vmem:[%s1468_s17 + $0x78] sm:$0x3] }
  0x19   : > { %v262_v28 = vsel %vm250_vm1, %v260_v25, %v261_v26  ;;  %v359_v34 = vsel %vm347_vm0, %v357_v29, %v358_v30  ;;  %v266_v48 = vrot.slane %v1552_v44, 1  ;;  %v267_v49 = vrot.slane %v193_v45, 1  ;;  %v1613_v10 = vld [vmem:[%s1468_s17 + $0x80] sm:$0xff]  ;;  %v199_v11 = vld [vmem:[%s1468_s17 + $0x88] sm:$0x3]  ;;  %v1624_v15 = vld [vmem:[%s1468_s17 + $0x90] sm:$0xff] }
  0x1a   : > { %398 = vrot.lane.b32.xlu1 %v353_v16, %s1427_s19  ;;  %301 = vrot.lane.b32.xlu0 %v256_v17, %s1428_s20  ;;  %v265_v43 = vsel %vm250_vm1, %v263_v41, %v264_v42  ;;  %v362_v50 = vsel %vm347_vm0, %v360_v46, %v361_v47  ;;  %v363_v52 = vrot.slane %v1552_v44, 2  ;;  %v364_v53 = vrot.slane %v193_v45, 2  ;;  %v1655_v35 = vld [vmem:[%s1468_s17 + $0xa0] sm:$0xff]  ;;  %v203_v38 = vld [vmem:[%s1468_s17 + $0xa8] sm:$0x3] }
  0x1b   : > { %v268_v51 = vsel %vm250_vm1, %v266_v48, %v267_v49  ;;  %v269_v57 = vrot.slane %v1577_v55, 1  ;;  %v270_v58 = vrot.slane %v195_v56, 1  ;;  %v366_v62 = vrot.slane %v1577_v55, 2  ;;  %v1672_v48 = vld [vmem:[%s1468_s17 + $0xb0] sm:$0xff]  ;;  %v205_v49 = vld [vmem:[%s1468_s17 + $0xb8] sm:$0x3] }
  0x1c   : > { %v365_v54 = vsel %vm347_vm0, %v363_v52, %v364_v53  ;;  %v367_v63 = vrot.slane %v195_v56, 2  ;;  %v272_v3 = vrot.slane %v1588_v60, 1  ;;  %v273_v4 = vrot.slane %v197_v61, 1 }
  0x1d   : > { %v271_v59 = vsel %vm250_vm1, %v269_v57, %v270_v58  ;;  %v369_v7 = vrot.slane %v1588_v60, 2  ;;  %v370_v8 = vrot.slane %v197_v61, 2  ;;  %v275_v12 = vrot.slane %v1613_v10, 1 }
  0x1e   : > { %303 = vrot.lane.b32.xlu1 %v259_v20, %s1428_s20  ;;  %497 = vrot.lane.b32.xlu0 %v256_v17, %s1429_s21  ;;  %v368_v5 = vsel %vm347_vm0, %v366_v62, %v367_v63  ;;  %v274_v6 = vsel %vm250_vm1, %v272_v3, %v273_v4  ;;  %v276_v13 = vrot.slane %v199_v11, 1  ;;  %v372_v17 = vrot.slane %v1613_v10, 2 }
  0x1f   : > { %v371_v9 = vsel %vm347_vm0, %v369_v7, %v370_v8  ;;  %v373_v18 = vrot.slane %v199_v11, 2  ;;  %v278_v19 = vrot.slane %v1624_v15, 1  ;;  %v375_v26 = vrot.slane %v1624_v15, 2 }
  0x20   : > { %v277_v14 = vsel %vm250_vm1, %v275_v12, %v276_v13  ;;  %v281_v40 = vrot.slane %v1655_v35, 1  ;;  %v282_v41 = vrot.slane %v203_v38, 1  ;;  %v284_v52 = vrot.slane %v1672_v48, 1 }
  0x21   : > { %v374_v22 = vsel %vm347_vm0, %v372_v17, %v373_v18  ;;  %v285_v53 = vrot.slane %v205_v49, 1  ;;  %v382_v3 = vrot.slane %v205_v49, 2 }
  0x22   : > { %548 = vrot.lane.b32.xlu1 %v353_v16, %s1430_s22  ;;  %499 = vrot.lane.b32.xlu0 %v259_v20, %s1429_s21  ;;  %v201_v16 = vld [vmem:[%s1468_s17 + $0x98] sm:$0x3]  ;;  %v283_v45 = vsel %vm250_vm1, %v281_v40, %v282_v41  ;;  %v1747_v41 = vld [vmem:[%s1468_s17 + $0xd0] sm:$0xff] }
  0x23   : > { %v290_v49 = vrot.slane %v1747_v41, 1 }
  0x26   : > { %400 = vrot.lane.b32.xlu1 %v356_v27, %s1427_s19  ;;  %305 = vrot.lane.b32.xlu0 %v262_v28, %s1428_s20 }
  0x2a   : > { %597 = vrot.lane.b32.xlu1 %v1471_v0, %s1431_s27  ;;  %550 = vrot.lane.b32.xlu0 %v356_v27, %s1430_s22 }
  0x2e   : > { %449 = vrot.lane.b32.xlu1 %v1501_v21, %s1426_s18  ;;  %402 = vrot.lane.b32.xlu0 %v359_v34, %s1427_s19 }
  0x32   : > { %649 = vrot.lane.b32.xlu1 %v259_v20, %s1432_s5  ;;  %599 = vrot.lane.b32.xlu0 %v1501_v21, %s1431_s27  ;;  %v279_v20 = vrot.slane %v201_v16, 1 }
  0x34   : > { %v280_v23 = vsel %vm250_vm1, %v278_v19, %v279_v20 }
  0x36   : > { %501 = vrot.lane.b32.xlu1 %v262_v28, %s1429_s21  ;;  %451 = vrot.lane.b32.xlu0 %v1541_v39, %s1426_s18 }
  0x3a   : > { %700 = vrot.lane.b32.xlu1 %v356_v27, %s1433_s8  ;;  %651 = vrot.lane.b32.xlu0 %v262_v28, %s1432_s5  ;;  %v376_v27 = vrot.slane %v201_v16, 2 }
  0x3c   : > { %v377_v30 = vsel %vm347_vm0, %v375_v26, %v376_v27  ;;  %v1729_v26 = vld [vmem:[%s1468_s17 + $0xc0] sm:$0xff] }
  0x3e   : > { %503 = vrot.lane.b32.xlu1 %v265_v43, %s1429_s21  ;;  %307 = vrot.lane.b32.xlu0 %v265_v43, %s1428_s20 }
  0x42   : > { %702 = vrot.lane.b32.xlu1 %v359_v34, %s1433_s8  ;;  %552 = vrot.lane.b32.xlu0 %v359_v34, %s1430_s22 }
  0x46   : > { %404 = vrot.lane.b32.xlu1 %v362_v50, %s1427_s19  ;;  %309 = vrot.lane.b32.xlu0 %v268_v51, %s1428_s20 }
  0x4a   : > { %601 = vrot.lane.b32.xlu1 %v1541_v39, %s1431_s27  ;;  %554 = vrot.lane.b32.xlu0 %v362_v50, %s1430_s22 }
  0x4e   : > { %453 = vrot.lane.b32.xlu1 %v1552_v44, %s1426_s18  ;;  %406 = vrot.lane.b32.xlu0 %v365_v54, %s1427_s19 }
  0x52   : > { %653 = vrot.lane.b32.xlu1 %v265_v43, %s1432_s5  ;;  %603 = vrot.lane.b32.xlu0 %v1552_v44, %s1431_s27 }
  0x56   : > { %505 = vrot.lane.b32.xlu1 %v268_v51, %s1429_s21  ;;  %455 = vrot.lane.b32.xlu0 %v1577_v55, %s1426_s18 }
  0x5a   : > { %704 = vrot.lane.b32.xlu1 %v362_v50, %s1433_s8  ;;  %655 = vrot.lane.b32.xlu0 %v268_v51, %s1432_s5  ;;  %v378_v50 = vrot.slane %v1655_v35, 2  ;;  %v379_v51 = vrot.slane %v203_v38, 2 }
  0x5c   : > { %v380_v58 = vsel %vm347_vm0, %v378_v50, %v379_v51 }
  0x5e   : > { %507 = vrot.lane.b32.xlu1 %v271_v59, %s1429_s21  ;;  %311 = vrot.lane.b32.xlu0 %v271_v59, %s1428_s20 }
  0x62   : > { %706 = vrot.lane.b32.xlu1 %v365_v54, %s1433_s8  ;;  %556 = vrot.lane.b32.xlu0 %v365_v54, %s1430_s22 }
  0x66   : > { %408 = vrot.lane.b32.xlu1 %v368_v5, %s1427_s19  ;;  %313 = vrot.lane.b32.xlu0 %v274_v6, %s1428_s20 }
  0x6a   : > { %605 = vrot.lane.b32.xlu1 %v1577_v55, %s1431_s27  ;;  %558 = vrot.lane.b32.xlu0 %v368_v5, %s1430_s22 }
  0x6e   : > { %457 = vrot.lane.b32.xlu1 %v1588_v60, %s1426_s18  ;;  %410 = vrot.lane.b32.xlu0 %v371_v9, %s1427_s19 }
  0x72   : > { %657 = vrot.lane.b32.xlu1 %v271_v59, %s1432_s5  ;;  %607 = vrot.lane.b32.xlu0 %v1588_v60, %s1431_s27  ;;  %v286_v59 = vsel %vm250_vm1, %v284_v52, %v285_v53 }
  0x76   : > { %509 = vrot.lane.b32.xlu1 %v274_v6, %s1429_s21  ;;  %459 = vrot.lane.b32.xlu0 %v1613_v10, %s1426_s18 }
  0x7a   : > { %708 = vrot.lane.b32.xlu1 %v368_v5, %s1433_s8  ;;  %659 = vrot.lane.b32.xlu0 %v274_v6, %s1432_s5 }
  0x7e   : > { %511 = vrot.lane.b32.xlu1 %v277_v14, %s1429_s21  ;;  %315 = vrot.lane.b32.xlu0 %v277_v14, %s1428_s20 }
  0x82   : > { %710 = vrot.lane.b32.xlu1 %v371_v9, %s1433_s8  ;;  %560 = vrot.lane.b32.xlu0 %v371_v9, %s1430_s22 }
  0x84   : > { %v1635_v24 = vpop.permute.xlu1 %447  ;;  %v446_v25 = vpop.permute.xlu0 %445 }
  0x86   : > { %412 = vrot.lane.b32.xlu1 %v374_v22, %s1427_s19  ;;  %317 = vrot.lane.b32.xlu0 %v280_v23, %s1428_s20 }
  0x88   : > { %v397_v28 = vpop.permute.xlu1 %396  ;;  %v300_v29 = vpop.permute.xlu0 %299 }
  0x89   : > { %v749_v57 = vsel %vm748_vm3, %v1477_v2, %v300_v29  ;;  %v381_v2 = vrot.slane %v1672_v48, 2  ;;  %v207_v29 = vld [vmem:[%s1468_s17 + $0xc8] sm:$0x3] }
  0x8a   : > { %609 = vrot.lane.b32.xlu1 %v1613_v10, %s1431_s27  ;;  %562 = vrot.lane.b32.xlu0 %v374_v22, %s1430_s22  ;;  %v766_v63 = vsel %vm765_vm4, %v749_v57, %v397_v28 }
  0x8b   : > { %v783_v4 = vsel %vm782_vm5, %v766_v63, %v446_v25  ;;  %v383_v12 = vsel %vm347_vm0, %v381_v2, %v382_v3  ;;  %v387_v63 = vrot.slane %v1747_v41, 2 }
  0x8c   : > { %v1644_v31 = vpop.permute.xlu1 %398  ;;  %v302_v32 = vpop.permute.xlu0 %301 }
  0x8d   : > { %v750_v8 = vsel %vm748_vm3, %v1474_v1, %v302_v32  ;;  %v288_v32 = vrot.slane %v207_v29, 1 }
  0x8e   : > { %461 = vrot.lane.b32.xlu1 %v1624_v15, %s1426_s18  ;;  %414 = vrot.lane.b32.xlu0 %v377_v30, %s1427_s19  ;;  %v767_v1 = vsel %vm765_vm4, %v750_v8, %v1644_v31  ;;  %v287_v31 = vrot.slane %v1729_v26, 1 }
  0x8f   : > { %v784_v18 = vsel %vm782_vm5, %v767_v1, %v1635_v24 }
  0x90   : > { %v1649_v33 = vpop.permute.xlu1 %303  ;;  %v498_v34 = vpop.permute.xlu0 %497 }
  0x91   : > { %v800_v7 = vsel %vm799_vm6, %v783_v4, %v498_v34 }
  0x92   : > { %661 = vrot.lane.b32.xlu1 %v277_v14, %s1432_s5  ;;  %611 = vrot.lane.b32.xlu0 %v1624_v15, %s1431_s27 }
  0x94   : > { %v549_v36 = vpop.permute.xlu1 %548  ;;  %v1657_v37 = vpop.permute.xlu0 %499 }
  0x95   : > { %v817_v9 = vsel %vm816_vm7, %v800_v7, %v549_v36 }
  0x96   : > { %513 = vrot.lane.b32.xlu1 %v280_v23, %s1429_s21  ;;  %463 = vrot.lane.b32.xlu0 %v1655_v35, %s1426_s18 }
  0x98   : > { %v1664_v42 = vpop.permute.xlu1 %400  ;;  %v1666_v43 = vpop.permute.xlu0 %305 }
  0x9a   : > { %712 = vrot.lane.b32.xlu1 %v374_v22, %s1433_s8  ;;  %663 = vrot.lane.b32.xlu0 %v280_v23, %s1432_s5  ;;  %v801_v22 = vsel %vm799_vm6, %v784_v18, %v1657_v37  ;;  %v289_v37 = vsel %vm250_vm1, %v287_v31, %v288_v32  ;;  %v1827_v32 = vld [vmem:[%s1468_s17 + $0xf0] sm:$0xff] }
  0x9c   : > { %v598_v46 = vpop.permute.xlu1 %597  ;;  %v551_v47 = vpop.permute.xlu0 %550 }
  0x9d   : > { %v834_v11 = vsel %vm833_vm8, %v817_v9, %v598_v46  ;;  %v818_v23 = vsel %vm816_vm7, %v801_v22, %v551_v47  ;;  %v384_v46 = vrot.slane %v1729_v26, 2  ;;  %v385_v47 = vrot.slane %v207_v29, 2 }
  0x9e   : > { %515 = vrot.lane.b32.xlu1 %v283_v45, %s1429_s21  ;;  %319 = vrot.lane.b32.xlu0 %v283_v45, %s1428_s20 }
  0x9f   : > { %v386_v53 = vsel %vm347_vm0, %v384_v46, %v385_v47 }
  0xa0   : > { %v1679_v54 = vpop.permute.xlu1 %449  ;;  %v1681_v56 = vpop.permute.xlu0 %402 }
  0xa2   : > { %714 = vrot.lane.b32.xlu1 %v377_v30, %s1433_s8  ;;  %564 = vrot.lane.b32.xlu0 %v377_v30, %s1430_s22 }
  0xa4   : > { %v650_v61 = vpop.permute.xlu1 %649  ;;  %v600_v62 = vpop.permute.xlu0 %599 }
  0xa5   : > { %v851_v13 = vsel %vm850_vm9, %v834_v11, %v650_v61  ;;  %v835_v25 = vsel %vm833_vm8, %v818_v23, %v600_v62  ;;  %v751_v61 = vsel %vm748_vm3, %v1471_v0, %v1649_v33  ;;  %v211_v23 = vld [vmem:[%s1468_s17 + $0xe8] sm:$0x3] }
  0xa6   : > { %416 = vrot.lane.b32.xlu1 %v380_v58, %s1427_s19  ;;  %321 = vrot.lane.b32.xlu0 %v286_v59, %s1428_s20  ;;  %v768_v62 = vsel %vm765_vm4, %v751_v61, %v1664_v42 }
  0xa7   : > { %v785_v3 = vsel %vm782_vm5, %v768_v62, %v1679_v54  ;;  %v393_v62 = vrot.slane %v1827_v32, 2 }
  0xa8   : > { %v1694_v5 = vpop.permute.xlu1 %501  ;;  %v1696_v6 = vpop.permute.xlu0 %451 }
  0xa9   : > { %v802_v0 = vsel %vm799_vm6, %v785_v3, %v1694_v5  ;;  %v752_v5 = vsel %vm748_vm3, %v1501_v21, %v1666_v43 }
  0xaa   : > { %613 = vrot.lane.b32.xlu1 %v1655_v35, %s1431_s27  ;;  %566 = vrot.lane.b32.xlu0 %v380_v58, %s1430_s22 }
  0xac   : > { %v701_v14 = vpop.permute.xlu1 %700  ;;  %v652_v16 = vpop.permute.xlu0 %651 }
  0xad   : > { %v868_v17 = vsel %vm867_vm10, %v851_v13, %v701_v14  ;;  %v852_v24 = vsel %vm850_vm9, %v835_v25, %v652_v16  ;;  %v769_v13 = vsel %vm765_vm4, %v752_v5, %v1681_v56 }
  0xae   : > { %465 = vrot.lane.b32.xlu1 %v1672_v48, %s1426_s18  ;;  %418 = vrot.lane.b32.xlu0 %v383_v12, %s1427_s19  ;;  %v786_v14 = vsel %vm782_vm5, %v769_v13, %v1696_v6  ;;  %v214_v13 = vld [vmem:[%s1468_s17 + $0x100] sm:$0xff] }
  0xaf   : > { %1363 = vmatprep.mubr.msk.f32.mxu0 %vm889_vm11, %v868_v17  ;;  %v1809_v17 = vld [vmem:[%s1468_s17 + $0xe0] sm:$0xff] }
  0xb0   : > { %v1717_v19 = vpop.permute.xlu1 %503  ;;  %v1719_v20 = vpop.permute.xlu0 %307  ;;  %v293_v25 = vrot.slane %v1809_v17, 1 }
  0xb1   : > { %v803_v21 = vsel %vm799_vm6, %v786_v14, %v1717_v19 }
  0xb2   : > { %665 = vrot.lane.b32.xlu1 %v283_v45, %s1432_s5  ;;  %615 = vrot.lane.b32.xlu0 %v1672_v48, %s1431_s27  ;;  %v209_v45 = vld [vmem:[%s1468_s17 + $0xd8] sm:$0x3] }
  0xb3   : > { %v291_v50 = vrot.slane %v209_v45, 1  ;;  %v388_v2 = vrot.slane %v209_v45, 2  ;;  %v296_v45 = vrot.slane %v1827_v32, 1 }
  0xb4   : > { %v703_v27 = vpop.permute.xlu1 %702  ;;  %v553_v28 = vpop.permute.xlu0 %552 }
  0xb5   : > { %v869_v30 = vsel %vm867_vm10, %v852_v24, %v703_v27  ;;  %v292_v57 = vsel %vm250_vm1, %v290_v49, %v291_v50  ;;  %v819_v33 = vsel %vm816_vm7, %v802_v0, %v553_v28  ;;  %v389_v8 = vsel %vm347_vm0, %v387_v63, %v388_v2 }
  0xb6   : > { %517 = vrot.lane.b32.xlu1 %v286_v59, %s1429_s21  ;;  %467 = vrot.lane.b32.xlu0 %v1729_v26, %s1426_s18  ;;  %v294_v24 = vrot.slane %v211_v23, 1 }
  0xb7   : > { %1364 = vmatmul.mubr.msk.f32.vlgmr.msra.gmra.mrb[0].mxu0 %vm889_vm11, %v869_v30 }
  0xb8   : > { %v1739_v34 = vpop.permute.xlu1 %404  ;;  %v1741_v36 = vpop.permute.xlu0 %309  ;;  %v295_v29 = vsel %vm250_vm1, %v293_v25, %v294_v24 }
  0xba   : > { %716 = vrot.lane.b32.xlu1 %v380_v58, %s1433_s8  ;;  %667 = vrot.lane.b32.xlu0 %v286_v59, %s1432_s5 }
  0xbc   : > { %v602_v38 = vpop.permute.xlu1 %601  ;;  %v555_v40 = vpop.permute.xlu0 %554 }
  0xbd   : > { %v836_v42 = vsel %vm833_vm8, %v819_v33, %v602_v38  ;;  %v820_v43 = vsel %vm816_vm7, %v803_v21, %v555_v40  ;;  %v390_v38 = vrot.slane %v1809_v17, 2  ;;  %v391_v40 = vrot.slane %v211_v23, 2 }
  0xbe   : > { %519 = vrot.lane.b32.xlu1 %v289_v37, %s1429_s21  ;;  %323 = vrot.lane.b32.xlu0 %v289_v37, %s1428_s20  ;;  %v545_v23 = vrot.slane %v214_v13, 2 }
  0xbf   : > { %v392_v50 = vsel %vm347_vm0, %v390_v38, %v391_v40  ;;  %v216_v38 = vld [vmem:[%s1468_s17 + $0x110] sm:$0xff]  ;;  %v217_v40 = vld [vmem:[%s1468_s17 + $0x118] sm:$0x3] }
  0xc0   : > { %v1754_v51 = vpop.permute.xlu1 %453  ;;  %v1756_v52 = vpop.permute.xlu0 %406 }
  0xc2   : > { %718 = vrot.lane.b32.xlu1 %v383_v12, %s1433_s8  ;;  %568 = vrot.lane.b32.xlu0 %v383_v12, %s1430_s22 }
  0xc4   : > { %v654_v58 = vpop.permute.xlu1 %653  ;;  %v604_v59 = vpop.permute.xlu0 %603 }
  0xc5   : > { %v853_v54 = vsel %vm850_vm9, %v836_v42, %v654_v58  ;;  %v837_v56 = vsel %vm833_vm8, %v820_v43, %v604_v59  ;;  %v753_v59 = vsel %vm748_vm3, %v1541_v39, %v1719_v20  ;;  %v215_v43 = vld [vmem:[%s1468_s17 + $0x108] sm:$0x3] }
  0xc6   : > { %420 = vrot.lane.b32.xlu1 %v386_v53, %s1427_s19  ;;  %325 = vrot.lane.b32.xlu0 %v292_v57, %s1428_s20  ;;  %v770_v61 = vsel %vm765_vm4, %v753_v59, %v1739_v34  ;;  %v546_v25 = vrot.slane %v215_v43, 2  ;;  %v697_v59 = vrot.slane %v216_v38, 2 }
  0xc7   : > { %v787_v2 = vsel %vm782_vm5, %v770_v61, %v1754_v51 }
  0xc8   : > { %v1772_v4 = vpop.permute.xlu1 %505  ;;  %v1774_v7 = vpop.permute.xlu0 %455 }
  0xc9   : > { %v804_v39 = vsel %vm799_vm6, %v787_v2, %v1772_v4  ;;  %v754_v4 = vsel %vm748_vm3, %v1552_v44, %v1741_v36 }
  0xca   : > { %617 = vrot.lane.b32.xlu1 %v1729_v26, %s1431_s27  ;;  %570 = vrot.lane.b32.xlu0 %v386_v53, %s1430_s22 }
  0xcc   : > { %v705_v9 = vpop.permute.xlu1 %704  ;;  %v656_v11 = vpop.permute.xlu0 %655 }
  0xcd   : > { %v870_v12 = vsel %vm867_vm10, %v853_v54, %v705_v9  ;;  %v854_v6 = vsel %vm850_vm9, %v837_v56, %v656_v11  ;;  %v771_v9 = vsel %vm765_vm4, %v754_v4, %v1756_v52 }
  0xce   : > { %469 = vrot.lane.b32.xlu1 %v1747_v41, %s1426_s18  ;;  %422 = vrot.lane.b32.xlu0 %v389_v8, %s1427_s19  ;;  %v788_v11 = vsel %vm782_vm5, %v771_v9, %v1774_v7 }
  0xcf   : > { %1366 = vmatprep.mubr.msk.f32.mxu0 %vm889_vm11, %v870_v12 }
  0xd0   : > { %v1797_v16 = vpop.permute.xlu1 %507  ;;  %v1799_v1 = vpop.permute.xlu0 %311 }
  0xd1   : > { %v805_v44 = vsel %vm799_vm6, %v788_v11, %v1797_v16  ;;  %v494_v16 = vrot.slane %v214_v13, 1 }
  0xd2   : > { %669 = vrot.lane.b32.xlu1 %v289_v37, %s1432_s5  ;;  %619 = vrot.lane.b32.xlu0 %v1747_v41, %s1431_s27  ;;  %v213_v37 = vld [vmem:[%s1468_s17 + $0xf8] sm:$0x3] }
  0xd3   : > { %v297_v46 = vrot.slane %v213_v37, 1  ;;  %v394_v63 = vrot.slane %v213_v37, 2 }
  0xd4   : > { %v707_v18 = vpop.permute.xlu1 %706  ;;  %v557_v22 = vpop.permute.xlu0 %556 }
  0xd5   : > { %v871_v19 = vsel %vm867_vm10, %v854_v6, %v707_v18  ;;  %v821_v20 = vsel %vm816_vm7, %v804_v39, %v557_v22  ;;  %v395_v33 = vsel %vm347_vm0, %v393_v62, %v394_v63  ;;  %v495_v6 = vrot.slane %v215_v43, 1 }
  0xd6   : > { %521 = vrot.lane.b32.xlu1 %v292_v57, %s1429_s21  ;;  %471 = vrot.lane.b32.xlu0 %v1809_v17, %s1426_s18  ;;  %v698_v62 = vrot.slane %v217_v40, 2 }
  0xd7   : > { %1367 = vmatmul.mubr.msk.f32.gmra.mrb[2].mxu0 %vm889_vm11, %v871_v19  ;;  %v496_v19 = vsel %vm250_vm1, %v494_v16, %v495_v6 }
  0xd8   : > { %v1819_v27 = vpop.permute.xlu1 %408  ;;  %v1821_v28 = vpop.permute.xlu0 %313 }
  0xda   : > { %720 = vrot.lane.b32.xlu1 %v386_v53, %s1433_s8  ;;  %671 = vrot.lane.b32.xlu0 %v292_v57, %s1432_s5  ;;  %v298_v53 = vsel %vm250_vm1, %v296_v45, %v297_v46  ;;  %v646_v45 = vrot.slane %v216_v38, 1  ;;  %v647_v46 = vrot.slane %v217_v40, 1 }
  0xdc   : > { %v606_v30 = vpop.permute.xlu1 %605  ;;  %v559_v31 = vpop.permute.xlu0 %558  ;;  %v648_v61 = vsel %vm250_vm1, %v646_v45, %v647_v46 }
  0xdd   : > { %v838_v34 = vsel %vm833_vm8, %v821_v20, %v606_v30  ;;  %v822_v36 = vsel %vm816_vm7, %v805_v44, %v559_v31  ;;  %v547_v30 = vsel %vm347_vm0, %v545_v23, %v546_v25 }
  0xde   : > { %523 = vrot.lane.b32.xlu1 %v295_v29, %s1429_s21  ;;  %327 = vrot.lane.b32.xlu0 %v295_v29, %s1428_s20 }
  0xe0   : > { %v1834_v47 = vpop.permute.xlu1 %457  ;;  %v1836_v49 = vpop.permute.xlu0 %410 }
  0xe2   : > { %722 = vrot.lane.b32.xlu1 %v389_v8, %s1433_s8  ;;  %572 = vrot.lane.b32.xlu0 %v389_v8, %s1430_s22 }
  0xe4   : > { %v658_v57 = vpop.permute.xlu1 %657  ;;  %v608_v58 = vpop.permute.xlu0 %607 }
  0xe5   : > { %v855_v51 = vsel %vm850_vm9, %v838_v34, %v658_v57  ;;  %v839_v52 = vsel %vm833_vm8, %v822_v36, %v608_v58  ;;  %v755_v57 = vsel %vm748_vm3, %v1577_v55, %v1799_v1 }
  0xe6   : > { %424 = vrot.lane.b32.xlu1 %v392_v50, %s1427_s19  ;;  %329 = vrot.lane.b32.xlu0 %v298_v53, %s1428_s20  ;;  %v772_v58 = vsel %vm765_vm4, %v755_v57, %v1819_v27  ;;  %v699_v27 = vsel %vm347_vm0, %v697_v59, %v698_v62 }
  0xe7   : > { %v789_v63 = vsel %vm782_vm5, %v772_v58, %v1834_v47 }
  0xe8   : > { %v1852_v3 = vpop.permute.xlu1 %509  ;;  %v1854_v0 = vpop.permute.xlu0 %459 }
  0xe9   : > { %v806_v20 = vsel %vm799_vm6, %v789_v63, %v1852_v3  ;;  %v756_v3 = vsel %vm748_vm3, %v1588_v60, %v1821_v28 }
  0xea   : > { %621 = vrot.lane.b32.xlu1 %v1809_v17, %s1431_s27  ;;  %574 = vrot.lane.b32.xlu0 %v392_v50, %s1430_s22 }
  0xec   : > { %v709_v42 = vpop.permute.xlu1 %708  ;;  %v660_v8 = vpop.permute.xlu0 %659 }
  0xed   : > { %v872_v54 = vsel %vm867_vm10, %v855_v51, %v709_v42  ;;  %v856_v14 = vsel %vm850_vm9, %v839_v52, %v660_v8  ;;  %v773_v42 = vsel %vm765_vm4, %v756_v3, %v1836_v49 }
  0xee   : > { %473 = vrot.lane.b32.xlu1 %v1827_v32, %s1426_s18  ;;  %426 = vrot.lane.b32.xlu0 %v395_v33, %s1427_s19  ;;  %v790_v8 = vsel %vm782_vm5, %v773_v42, %v1854_v0 }
  0xef   : > { %1369 = vmatprep.mubr.msk.f32.mxu0 %vm889_vm11, %v872_v54 }
  0xf0   : > { %v1877_v12 = vpop.permute.xlu1 %511  ;;  %v1879_v5 = vpop.permute.xlu0 %315 }
  0xf1   : > { %v807_v9 = vsel %vm799_vm6, %v790_v8, %v1877_v12 }
  0xf2   : > { %673 = vrot.lane.b32.xlu1 %v295_v29, %s1432_s5  ;;  %623 = vrot.lane.b32.xlu0 %v1827_v32, %s1431_s27 }
  0xf4   : > { %v711_v7 = vpop.permute.xlu1 %710  ;;  %v561_v21 = vpop.permute.xlu0 %560 }
  0xf5   : > { %v873_v56 = vsel %vm867_vm10, %v856_v14, %v711_v7  ;;  %v823_v55 = vsel %vm816_vm7, %v806_v20, %v561_v21 }
  0xf6   : > { %525 = vrot.lane.b32.xlu1 %v298_v53, %s1429_s21  ;;  %475 = vrot.lane.b32.xlu0 %v214_v13, %s1426_s18  ;;  %s177_s18 = scalar_lea.vmem %s2076_s2, %s1331_s15 }
  0xf7   : > { %1370 = vmatmul.mubr.msk.f32.gmra.mrb[4].mxu0 %vm889_vm11, %v873_v56  ;;  %v757_v56 = vsel %vm748_vm3, %v1613_v10, %v1879_v5 }
  0xf8   : > { %v1895_v18 = vpop.permute.xlu1 %412  ;;  %v1897_v22 = vpop.permute.xlu0 %317 }
  0xf9   : > { %v774_v16 = vsel %vm765_vm4, %v757_v56, %v1895_v18  ;;  %v758_v10 = vsel %vm748_vm3, %v1624_v15, %v1897_v22 }
  0xfa   : > { %724 = vrot.lane.b32.xlu1 %v392_v50, %s1433_s8  ;;  %675 = vrot.lane.b32.xlu0 %v298_v53, %s1432_s5 }
  0xfc   : > { %v610_v24 = vpop.permute.xlu1 %609  ;;  %v563_v29 = vpop.permute.xlu0 %562 }
  0xfd   : > { %v840_v1 = vsel %vm833_vm8, %v823_v55, %v610_v24  ;;  %v824_v11 = vsel %vm816_vm7, %v807_v9, %v563_v29 }
  0xfe   : > { %576 = vrot.lane.b32.xlu1 %v395_v33, %s1430_s22  ;;  %527 = vrot.lane.b32.xlu0 %v496_v19, %s1429_s21 }
 0x100   : > { %v462_v31 = vpop.permute.xlu1 %461  ;;  %v1905_v37 = vpop.permute.xlu0 %414 }
 0x101   : > { %v791_v6 = vsel %vm782_vm5, %v774_v16, %v462_v31  ;;  %v775_v5 = vsel %vm765_vm4, %v758_v10, %v1905_v37 }
 0x102   : > { %578 = vrot.lane.b32.xlu1 %v547_v30, %s1430_s22  ;;  %726 = vrot.lane.b32.xlu0 %v395_v33, %s1433_s8 }
 0x104   : > { %v662_v50 = vpop.permute.xlu1 %661  ;;  %v612_v53 = vpop.permute.xlu0 %611 }
 0x105   : > { %v857_v34 = vsel %vm850_vm9, %v840_v1, %v662_v50  ;;  %v841_v60 = vsel %vm833_vm8, %v824_v11, %v612_v53 }
 0x106   : > { %627 = vrot.lane.b32.xlu1 %v216_v38, %s1431_s27  ;;  %625 = vrot.lane.b32.xlu0 %v214_v13, %s1431_s27 }
 0x108   : > { %v514_v2 = vpop.permute.xlu1 %513  ;;  %v464_v39 = vpop.permute.xlu0 %463 }
 0x109   : > { %v808_v25 = vsel %vm799_vm6, %v791_v6, %v514_v2  ;;  %v792_v18 = vsel %vm782_vm5, %v775_v5, %v464_v39 }
 0x10a   : > { %679 = vrot.lane.b32.xlu1 %v648_v61, %s1432_s5  ;;  %677 = vrot.lane.b32.xlu0 %v496_v19, %s1432_s5 }
 0x10c   : > { %v713_v33 = vpop.permute.xlu1 %712  ;;  %v664_v51 = vpop.permute.xlu0 %663 }
 0x10d   : > { %v874_v47 = vsel %vm867_vm10, %v857_v34, %v713_v33  ;;  %v858_v28 = vsel %vm850_vm9, %v841_v60, %v664_v51 }
 0x10e   : > { %730 = vrot.lane.b32.xlu1 %v699_v27, %s1433_s8  ;;  %728 = vrot.lane.b32.xlu0 %v547_v30, %s1433_s8 }
 0x10f   : > { %1372 = vmatprep.mubr.msk.f32.mxu0 %vm889_vm11, %v874_v47 }
 0x110   : > { %v516_v54 = vpop.permute.xlu1 %515  ;;  %v320_v4 = vpop.permute.xlu0 %319 }
 0x111   : > { %v809_v50 = vsel %vm799_vm6, %v792_v18, %v516_v54  ;;  %v759_v1 = vsel %vm748_vm3, %v1655_v35, %v320_v4 }
 0x114   : > { %v715_v44 = vpop.permute.xlu1 %714  ;;  %v565_v36 = vpop.permute.xlu0 %564 }
 0x115   : > { %v875_v49 = vsel %vm867_vm10, %v858_v28, %v715_v44  ;;  %v825_v24 = vsel %vm816_vm7, %v808_v25, %v565_v36 }
 0x116   : > { %1373 = vmatmul.mubr.msk.f32.gmra.mrb[6].mxu0 %vm889_vm11, %v875_v49 }
 0x118   : > { %v417_v52 = vpop.permute.xlu1 %416  ;;  %v322_v13 = vpop.permute.xlu0 %321 }
 0x119   : > { %v776_v27 = vsel %vm765_vm4, %v759_v1, %v417_v52  ;;  %v760_v35 = vsel %vm748_vm3, %v1672_v48, %v322_v13 }
 0x11c   : > { %v614_v0 = vpop.permute.xlu1 %613  ;;  %v567_v14 = vpop.permute.xlu0 %566 }
 0x11d   : > { %v842_v29 = vsel %vm833_vm8, %v825_v24, %v614_v0  ;;  %v826_v53 = vsel %vm816_vm7, %v809_v50, %v567_v14 }
 0x120   : > { %v466_v7 = vpop.permute.xlu1 %465  ;;  %v419_v21 = vpop.permute.xlu0 %418 }
 0x121   : > { %v793_v34 = vsel %vm782_vm5, %v776_v27, %v466_v7  ;;  %v777_v4 = vsel %vm765_vm4, %v760_v35, %v419_v21 }
 0x124   : > { %v666_v43 = vpop.permute.xlu1 %665  ;;  %v616_v12 = vpop.permute.xlu0 %615 }
 0x125   : > { %v859_v30 = vsel %vm850_vm9, %v842_v29, %v666_v43  ;;  %v843_v57 = vsel %vm833_vm8, %v826_v53, %v616_v12 }
 0x128   : > { %v518_v23 = vpop.permute.xlu1 %517  ;;  %v468_v19 = vpop.permute.xlu0 %467 }
 0x129   : > { %v810_v47 = vsel %vm799_vm6, %v793_v34, %v518_v23  ;;  %v794_v60 = vsel %vm782_vm5, %v777_v4, %v468_v19 }
 0x12c   : > { %v717_v38 = vpop.permute.xlu1 %716  ;;  %v668_v40 = vpop.permute.xlu0 %667 }
 0x12d   : > { %v876_v45 = vsel %vm867_vm10, %v859_v30, %v717_v38  ;;  %v860_v58 = vsel %vm850_vm9, %v843_v57, %v668_v40 }
 0x12e   : > { %1375 = vmatprep.mubr.msk.f32.mxu1 %vm889_vm11, %v876_v45 }
 0x130   : > { %v520_v31 = vpop.permute.xlu1 %519  ;;  %v324_v46 = vpop.permute.xlu0 %323 }
 0x131   : > { %v811_v36 = vsel %vm799_vm6, %v794_v60, %v520_v31  ;;  %v761_v19 = vsel %vm748_vm3, %v1729_v26, %v324_v46 }
 0x134   : > { %v719_v59 = vpop.permute.xlu1 %718  ;;  %v569_v61 = vpop.permute.xlu0 %568 }
 0x135   : > { %v877_v15 = vsel %vm867_vm10, %v860_v58, %v719_v59  ;;  %v827_v3 = vsel %vm816_vm7, %v810_v47, %v569_v61 }
 0x136   : > { %1376 = vmatmul.mubr.msk.f32.vlgmr.msra.gmra.mrb[0].mxu1 %vm889_vm11, %v877_v15 }
 0x138   : > { %v421_v22 = vpop.permute.xlu1 %420  ;;  %v326_v37 = vpop.permute.xlu0 %325 }
 0x139   : > { %v778_v25 = vsel %vm765_vm4, %v761_v19, %v421_v22  ;;  %v762_v26 = vsel %vm748_vm3, %v1747_v41, %v326_v37 }
 0x13c   : > { %v618_v62 = vpop.permute.xlu1 %617  ;;  %v571_v63 = vpop.permute.xlu0 %570 }
 0x13d   : > { %v844_v42 = vsel %vm833_vm8, %v827_v3, %v618_v62  ;;  %v828_v49 = vsel %vm816_vm7, %v811_v36, %v571_v63 }
 0x140   : > { %v470_v2 = vpop.permute.xlu1 %469  ;;  %v423_v39 = vpop.permute.xlu0 %422 }
 0x141   : > { %v795_v24 = vsel %vm782_vm5, %v778_v25, %v470_v2  ;;  %v779_v46 = vsel %vm765_vm4, %v762_v26, %v423_v39 }
 0x144   : > { %v670_v20 = vpop.permute.xlu1 %669  ;;  %v620_v55 = vpop.permute.xlu0 %619 }
 0x145   : > { %v861_v8 = vsel %vm850_vm9, %v844_v42, %v670_v20  ;;  %v845_v52 = vsel %vm833_vm8, %v828_v49, %v620_v55 }
 0x148   : > { %v522_v33 = vpop.permute.xlu1 %521  ;;  %v472_v51 = vpop.permute.xlu0 %471 }
 0x149   : > { %v812_v38 = vsel %vm799_vm6, %v795_v24, %v522_v33  ;;  %v796_v50 = vsel %vm782_vm5, %v779_v46, %v472_v51 }
 0x14c   : > { %v721_v54 = vpop.permute.xlu1 %720  ;;  %v672_v9 = vpop.permute.xlu0 %671 }
 0x14d   : > { %v878_v11 = vsel %vm867_vm10, %v861_v8, %v721_v54  ;;  %v862_v0 = vsel %vm850_vm9, %v845_v52, %v672_v9 }
 0x14e   : > { %1378 = vmatprep.mubr.msk.f32.mxu1 %vm889_vm11, %v878_v11 }
 0x150   : > { %v524_v28 = vpop.permute.xlu1 %523  ;;  %v328_v44 = vpop.permute.xlu0 %327 }
 0x151   : > { %v813_v58 = vsel %vm799_vm6, %v796_v50, %v524_v28  ;;  %v763_v2 = vsel %vm748_vm3, %v1809_v17, %v328_v44 }
 0x154   : > { %v723_v14 = vpop.permute.xlu1 %722  ;;  %v573_v7 = vpop.permute.xlu0 %572 }
 0x155   : > { %v879_v48 = vsel %vm867_vm10, %v862_v0, %v723_v14  ;;  %v829_v40 = vsel %vm816_vm7, %v812_v38, %v573_v7 }
 0x156   : > { %1379 = vmatmul.mubr.msk.f32.gmra.mrb[2].mxu1 %vm889_vm11, %v879_v48 }
 0x158   : > { %v425_v13 = vpop.permute.xlu1 %424  ;;  %v330_v21 = vpop.permute.xlu0 %329 }
 0x159   : > { %v764_v39 = vsel %vm748_vm3, %v1827_v32, %v330_v21  ;;  %v780_v20 = vsel %vm765_vm4, %v763_v2, %v425_v13 }
 0x15c   : > { %v622_v43 = vpop.permute.xlu1 %621  ;;  %v575_v12 = vpop.permute.xlu0 %574 }
 0x15d   : > { %v846_v45 = vsel %vm833_vm8, %v829_v40, %v622_v43  ;;  %v830_v59 = vsel %vm816_vm7, %v813_v58, %v575_v12 }
 0x160   : > { %v474_v56 = vpop.permute.xlu1 %473  ;;  %v427_v16 = vpop.permute.xlu0 %426 }
 0x161   : > { %v781_v55 = vsel %vm765_vm4, %v764_v39, %v427_v16  ;;  %v797_v1 = vsel %vm782_vm5, %v780_v20, %v474_v56 }
 0x164   : > { %v674_v6 = vpop.permute.xlu1 %673  ;;  %v624_v23 = vpop.permute.xlu0 %623 }
 0x165   : > { %v863_v10 = vsel %vm850_vm9, %v846_v45, %v674_v6  ;;  %v847_v61 = vsel %vm833_vm8, %v830_v59, %v624_v23 }
 0x168   : > { %v526_v29 = vpop.permute.xlu1 %525  ;;  %v476_v30 = vpop.permute.xlu0 %475 }
 0x169   : > { %v798_v27 = vsel %vm782_vm5, %v781_v55, %v476_v30  ;;  %v814_v51 = vsel %vm799_vm6, %v797_v1, %v526_v29 }
 0x16c   : > { %v725_v5 = vpop.permute.xlu1 %724  ;;  %v676_v18 = vpop.permute.xlu0 %675 }
 0x16d   : > { %v880_v31 = vsel %vm867_vm10, %v863_v10, %v725_v5  ;;  %v864_v15 = vsel %vm850_vm9, %v847_v61, %v676_v18 }
 0x16e   : > { %1381 = vmatprep.mubr.msk.f32.mxu1 %vm889_vm11, %v880_v31 }
 0x170   : > { %v577_v53 = vpop.permute.xlu1 %576  ;;  %v528_v57 = vpop.permute.xlu0 %527 }
 0x171   : > { %v815_v47 = vsel %vm799_vm6, %v798_v27, %v528_v57  ;;  %v831_v3 = vsel %vm816_vm7, %v814_v51, %v577_v53 }
 0x174   : > { %v579_v22 = vpop.permute.xlu1 %578  ;;  %v727_v62 = vpop.permute.xlu0 %726 }
 0x175   : > { %v881_v41 = vsel %vm867_vm10, %v864_v15, %v727_v62  ;;  %v832_v17 = vsel %vm816_vm7, %v815_v47, %v579_v22 }
 0x176   : > { %1382 = vmatmul.mubr.msk.f32.gmra.mrb[4].mxu1 %vm889_vm11, %v881_v41 }
 0x178   : > { %v628_v37 = vpop.permute.xlu1 %627  ;;  %v626_v63 = vpop.permute.xlu0 %625 }
 0x179   : > { %v849_v32 = vsel %vm833_vm8, %v832_v17, %v628_v37  ;;  %v848_v42 = vsel %vm833_vm8, %v831_v3, %v626_v63 }
 0x17c   : > { %v680_v34 = vpop.permute.xlu1 %679  ;;  %v678_v33 = vpop.permute.xlu0 %677 }
 0x17d   : > { %v866_v8 = vsel %vm850_vm9, %v849_v32, %v680_v34  ;;  %v865_v54 = vsel %vm850_vm9, %v848_v42, %v678_v33 }
 0x180   : > { %v731_v9 = vpop.permute.xlu1 %730  ;;  %v729_v11 = vpop.permute.xlu0 %728 }
 0x181   : > { %v883_v35 = vsel %vm867_vm10, %v866_v8, %v731_v9  ;;  %v882_v4 = vsel %vm867_vm10, %v865_v54, %v729_v11 }
 0x182   : > { %1384 = vmatprep.mubr.msk.f32.mxu1 %vm889_vm11, %v882_v4 }
 0x183   : > { %1385 = vmatmul.mubr.msk.f32.gmra.mrb[6].mxu1 %vm889_vm11, %v883_v35 }
 0x18a   : > { %v1365_v60 = vpop.f32.mrb[0].mxu0 }
 0x18b   : > { %v1088_v28 = vsel %vm799_vm6, %v1365_v60, 0.0  ;;  %v1126_v44 = vmul.f32 %v1365_v60, %v1365_v60  ;;  %v1008_v36 = vpop.f32.mrb[1].mxu0 }
 0x18c   : > { %v1087_v49 = vsel %vm799_vm6, %v1008_v36, 0.0  ;;  %v1125_v52 = vmul.f32 %v1008_v36, %v1008_v36  ;;  %1179 = vxpose.xlu0.b32.start [1/16] (narrow) %v1008_v36, 16 }
 0x18d   : > { %v1142_v0 = vsel %vm799_vm6, %v1126_v44, 0.0  ;;  %v1089_v14 = vadd.f32 %v1088_v28, %v1087_v49 }
 0x18e   : > { %v1141_v7 = vsel %vm799_vm6, %v1125_v52, 0.0 }
 0x18f   : > { %v1143_v48 = vadd.f32 %v1142_v0, %v1141_v7 }
 0x190   : > { %1180 = vxpose.xlu0.b32.cont [2/16] (narrow) %v1365_v60, 16 }
 0x1aa   : > { %v1368_v13 = vpop.f32.mrb[2].mxu0 }
 0x1ab   : > { %v1018_v21 = vpop.f32.mrb[3].mxu0  ;;  %v1128_v43 = vmul.f32 %v1368_v13, %v1368_v13  ;;  %v1092_v6 = vsel %vm799_vm6, %v1368_v13, 0.0 }
 0x1ac   : > { %v1090_v12 = vsel %vm799_vm6, %v1018_v21, 0.0  ;;  %v1127_v56 = vmul.f32 %v1018_v21, %v1018_v21  ;;  %1181 = vxpose.xlu0.b32.cont [3/16] (narrow) %v1018_v21, 16 }
 0x1ad   : > { %v1091_v16 = vadd.f32 %v1090_v12, %v1089_v14  ;;  %v1146_v24 = vsel %vm799_vm6, %v1128_v43, 0.0 }
 0x1ae   : > { %v1144_v23 = vsel %vm799_vm6, %v1127_v56, 0.0 }
 0x1af   : > { %v1145_v19 = vadd.f32 %v1144_v23, %v1143_v48  ;;  %v1093_v25 = vadd.f32 %v1092_v6, %v1091_v16 }
 0x1b0   : > { %1182 = vxpose.xlu0.b32.cont [4/16] (narrow) %v1368_v13, 16 }
 0x1b1   : > { %v1147_v29 = vadd.f32 %v1146_v24, %v1145_v19 }
 0x1ca   : > { %v1371_v30 = vpop.f32.mrb[4].mxu0 }
 0x1cb   : > { %v1028_v38 = vpop.f32.mrb[5].mxu0  ;;  %v1130_v40 = vmul.f32 %v1371_v30, %v1371_v30  ;;  %v1096_v18 = vsel %vm799_vm6, %v1371_v30, 0.0 }
 0x1cc   : > { %v1094_v45 = vsel %vm799_vm6, %v1028_v38, 0.0  ;;  %v1129_v10 = vmul.f32 %v1028_v38, %v1028_v38  ;;  %1183 = vxpose.xlu0.b32.cont [5/16] (narrow) %v1028_v38, 16 }
 0x1cd   : > { %v1095_v5 = vadd.f32 %v1094_v45, %v1093_v25  ;;  %v1150_v50 = vsel %vm799_vm6, %v1130_v40, 0.0 }
 0x1ce   : > { %v1148_v31 = vsel %vm799_vm6, %v1129_v10, 0.0 }
 0x1cf   : > { %v1149_v26 = vadd.f32 %v1148_v31, %v1147_v29  ;;  %v1097_v46 = vadd.f32 %v1096_v18, %v1095_v5 }
 0x1d0   : > { %1184 = vxpose.xlu0.b32.cont [6/16] (narrow) %v1371_v30, 16 }
 0x1d1   : > { %v1151_v53 = vadd.f32 %v1150_v50, %v1149_v26 }
 0x1e9   : > { %v1374_v57 = vpop.f32.mrb[6].mxu0 }
 0x1ea   : > { %v1038_v58 = vpop.f32.mrb[7].mxu0  ;;  %v1132_v59 = vmul.f32 %v1374_v57, %v1374_v57  ;;  %v1100_v62 = vsel %vm799_vm6, %v1374_v57, 0.0 }
 0x1eb   : > { %v1098_v61 = vsel %vm799_vm6, %v1038_v58, 0.0  ;;  %v1131_v15 = vmul.f32 %v1038_v58, %v1038_v58  ;;  %1185 = vxpose.xlu0.b32.cont [7/16] (narrow) %v1038_v58, 16 }
 0x1ec   : > { %v1099_v22 = vadd.f32 %v1098_v61, %v1097_v46  ;;  %v1154_v2 = vsel %vm799_vm6, %v1132_v59, 0.0 }
 0x1ed   : > { %v1152_v41 = vsel %vm799_vm6, %v1131_v15, 0.0 }
 0x1ee   : > { %v1101_v37 = vadd.f32 %v1100_v62, %v1099_v22  ;;  %v1153_v63 = vadd.f32 %v1152_v41, %v1151_v53 }
 0x1ef   : > { %1186 = vxpose.xlu0.b32.cont [8/16] (narrow) %v1374_v57, 16 }
 0x1f0   : > { %v1155_v39 = vadd.f32 %v1154_v2, %v1153_v63 }
 0x209   : > { %v1377_v20 = vpop.f32.mrb[0].mxu1 }
 0x20a   : > { %v1048_v55 = vpop.f32.mrb[1].mxu1  ;;  %v1134_v1 = vmul.f32 %v1377_v20, %v1377_v20  ;;  %v1104_v51 = vsel %vm799_vm6, %v1377_v20, 0.0 }
 0x20b   : > { %v1102_v27 = vsel %vm799_vm6, %v1048_v55, 0.0  ;;  %v1133_v34 = vmul.f32 %v1048_v55, %v1048_v55  ;;  %1187 = vxpose.xlu0.b32.cont [9/16] (narrow) %v1048_v55, 16 }
 0x20c   : > { %v1103_v33 = vadd.f32 %v1102_v27, %v1101_v37  ;;  %v1158_v32 = vsel %vm799_vm6, %v1134_v1, 0.0 }
 0x20d   : > { %v1156_v47 = vsel %vm799_vm6, %v1133_v34, 0.0 }
 0x20e   : > { %v1157_v3 = vadd.f32 %v1156_v47, %v1155_v39  ;;  %v1105_v17 = vadd.f32 %v1104_v51, %v1103_v33 }
 0x20f   : > { %1188 = vxpose.xlu0.b32.cont [10/16] (narrow) %v1377_v20, 16 }
 0x210   : > { %v1159_v42 = vadd.f32 %v1158_v32, %v1157_v3 }
 0x229   : > { %v1380_v8 = vpop.f32.mrb[2].mxu1 }
 0x22a   : > { %v1058_v54 = vpop.f32.mrb[3].mxu1  ;;  %v1136_v9 = vmul.f32 %v1380_v8, %v1380_v8  ;;  %v1108_v60 = vsel %vm799_vm6, %v1380_v8, 0.0 }
 0x22b   : > { %v1106_v11 = vsel %vm799_vm6, %v1058_v54, 0.0  ;;  %v1135_v35 = vmul.f32 %v1058_v54, %v1058_v54  ;;  %1189 = vxpose.xlu0.b32.cont [11/16] (narrow) %v1058_v54, 16 }
 0x22c   : > { %v1107_v4 = vadd.f32 %v1106_v11, %v1105_v17  ;;  %v1162_v49 = vsel %vm799_vm6, %v1136_v9, 0.0 }
 0x22d   : > { %v1160_v28 = vsel %vm799_vm6, %v1135_v35, 0.0 }
 0x22e   : > { %v1161_v44 = vadd.f32 %v1160_v28, %v1159_v42  ;;  %v1109_v36 = vadd.f32 %v1108_v60, %v1107_v4 }
 0x22f   : > { %1190 = vxpose.xlu0.b32.cont [12/16] (narrow) %v1380_v8, 16 }
 0x230   : > { %v1163_v52 = vadd.f32 %v1162_v49, %v1161_v44 }
 0x249   : > { %v1383_v0 = vpop.f32.mrb[4].mxu1 }
 0x24a   : > { %v1068_v14 = vpop.f32.mrb[5].mxu1  ;;  %v1138_v7 = vmul.f32 %v1383_v0, %v1383_v0  ;;  %v1112_v43 = vsel %vm799_vm6, %v1383_v0, 0.0 }
 0x24b   : > { %v1110_v48 = vsel %vm799_vm6, %v1068_v14, 0.0  ;;  %v1137_v13 = vmul.f32 %v1068_v14, %v1068_v14  ;;  %1191 = vxpose.xlu0.b32.cont [13/16] (narrow) %v1068_v14, 16 }
 0x24c   : > { %v1111_v21 = vadd.f32 %v1110_v48, %v1109_v36  ;;  %v1166_v6 = vsel %vm799_vm6, %v1138_v7, 0.0 }
 0x24d   : > { %v1164_v12 = vsel %vm799_vm6, %v1137_v13, 0.0 }
 0x24e   : > { %v1165_v56 = vadd.f32 %v1164_v12, %v1163_v52  ;;  %v1113_v16 = vadd.f32 %v1112_v43, %v1111_v21 }
 0x24f   : > { %1192 = vxpose.xlu0.b32.cont [14/16] (narrow) %v1383_v0, 16 }
 0x250   : > { %v1167_v23 = vadd.f32 %v1166_v6, %v1165_v56 }
 0x256   : > { %v1386_v19 = vpop.f32.mrb[6].mxu1 }
 0x257   : > { %v1078_v25 = vpop.f32.mrb[7].mxu1  ;;  %v1140_v24 = vmul.f32 %v1386_v19, %v1386_v19  ;;  %v1116_v40 = vsel %vm799_vm6, %v1386_v19, 0.0 }
 0x258   : > { %v1114_v29 = vsel %vm799_vm6, %v1078_v25, 0.0  ;;  %v1139_v30 = vmul.f32 %v1078_v25, %v1078_v25  ;;  %1193 = vxpose.xlu0.b32.cont [15/16] (narrow) %v1078_v25, 16 }
 0x259   : > { %v1115_v38 = vadd.f32 %v1114_v29, %v1113_v16  ;;  %v1170_v18 = vsel %vm799_vm6, %v1140_v24, 0.0 }
 0x25a   : > { %v1168_v45 = vsel %vm799_vm6, %v1139_v30, 0.0 }
 0x25b   : > { %v1117_v10 = vadd.f32 %v1116_v40, %v1115_v38  ;;  %v1169_v5 = vadd.f32 %v1168_v45, %v1167_v23 }
 0x25c   : > { %1194 = vxpose.xlu0.b32.end [16/16] (narrow) %v1386_v19, 16 }
 0x25d   : > { %v1118_v31 = vrot.slane %v1117_v10, 4  ;;  %v1171_v26 = vadd.f32 %v1170_v18, %v1169_v5 }
 0x25f   : > { %v1119_v46 = vadd.f32 %v1118_v31, %v1117_v10  ;;  %v1172_v50 = vrot.slane %v1171_v26, 4 }
 0x261   : > { %v1120_v53 = vrot.slane %v1119_v46, 2  ;;  %v1173_v57 = vadd.f32 %v1172_v50, %v1171_v26 }
 0x263   : > { %v1121_v58 = vadd.f32 %v1120_v53, %v1119_v46  ;;  %v1174_v59 = vrot.slane %v1173_v57, 2 }
 0x265   : > { %v1122_v61 = vrot.slane %v1121_v58, 1  ;;  %v1175_v15 = vadd.f32 %v1174_v59, %v1173_v57 }
 0x267   : > { %v1176_v22 = vrot.slane %v1175_v15, 1  ;;  %v1123_v62 = vadd.f32 %v1122_v61, %v1121_v58 }
 0x269   : > { %v1177_v41 = vadd.f32 %v1176_v22, %v1175_v15 }
 0x26b   : > { %v1214_v37 = vsel %vm1213_vm12, %v1123_v62, %v1177_v41 }
 0x26c   : > { %1216 = vst.msk [vmem:[%s181_s14] sm:$0x3] %vm1215_vm13, %v1214_v37 }
 0x2a0   : > { %v1195_v63 = vpop.trf.xlu0 }
 0x2a1   : > { %1211 = vst [vmem:[%s177_s18] sm:$0xff] %v1195_v63 }
 0x2a4   : > { %v1196_v2 = vpop.trf.xlu0 }
 0x2a5   : > { %1212 = vst [vmem:[%s177_s18 + $0x8] sm:$0xff] %v1196_v2 }
 0x2a6 PF: > { %s14_s12 = sadd.s32 1, %s1424_s12  }
 0x2a7   : > { %p11_p4 = scmp.ge.s32.totalorder %s14_s12, 4  }
 0x2a9   :  { %13 = sbr.rel (!%p11_p4) target bundleno = 1 (0x1), region = 70 }

</bundles_post_ra>
